<compile_context>
chip_gen: v7x
topology: tpu7x:2x2x1
jax: 0.10.0
libtpu: 0.0.40
codegen_flags: <defaults>
</compile_context>

<pallas_src>
import functools

import jax
import jax.numpy as jnp
from jax.experimental import pallas as pl
from jax.experimental.pallas import tpu as pltpu

_LANE = 128
_SUBLANE = 8  # f32 sublanes per vreg (accumulation is always f32)


def _round_up(x, m):
    return (x + m - 1) // m * m


def _sublane_multiple(dtype):
    itemsize = jnp.dtype(dtype).itemsize
    return {4: 8, 2: 16, 1: 32}.get(itemsize, 8)


def _mse_mae_sum_kernel(p_ref, g_ref, sq_out, ab_out, sq_acc, ab_acc, *,
                        bm, rows, steps_per_core, total_blocks, need_mask):
    """Streaming sum((p-g)^2) and sum(|p-g|) into per-core (8,128) partials."""
    c = pl.program_id(0)            # core-split (parallel) axis
    i = pl.program_id(1)            # streaming (reduction / arbitrary) axis
    blk = c * steps_per_core + i    # absolute, UNclamped block index

    @pl.when(i == 0)
    def _():
        sq_acc[...] = jnp.zeros_like(sq_acc)
        ab_acc[...] = jnp.zeros_like(ab_acc)

    # Skip fully-out-of-range duplicate blocks (only possible on the last core
    # when total_blocks is odd); their DMA fetches clamped-duplicate data that
    # must not be accumulated.
    @pl.when(blk < total_blocks)
    def _():
        d = p_ref[...].astype(jnp.float32) - g_ref[...].astype(jnp.float32)
        if need_mask:
            # Mask the ragged rows of the last real block (select -> no NaN
            # propagation from garbage padding).
            row = jax.lax.broadcasted_iota(jnp.int32, (bm, _LANE), 0) + blk * bm
            d = jnp.where(row < rows, d, 0.0)
        sq = (d * d).reshape(bm // _SUBLANE, _SUBLANE, _LANE)
        ab = jnp.abs(d).reshape(bm // _SUBLANE, _SUBLANE, _LANE)
        # VPU tree-add of bm/8 vregs -> one vreg; single load+store on scratch.
        sq_acc[...] += jnp.sum(sq, axis=0)
        ab_acc[...] += jnp.sum(ab, axis=0)

    @pl.when(i == steps_per_core - 1)
    def _():
        # Write the per-core single-vreg partials; cross-sublane/lane reduce
        # happens (cheaply) outside the kernel.
        sq_out[...] = sq_acc[...]
        ab_out[...] = ab_acc[...]


def _fused_sq_abs_sums(prediction, groundtruth, *, block_rows=4096, num_cores=2):
    """Returns (sum((p-g)^2), sum(|p-g|), element_count) with one HBM pass."""
    assert prediction.shape == groundtruth.shape, "shape mismatch"
    count = 1
    for s in prediction.shape:
        count *= s
    if count == 0:
        raise ValueError("ReconstructionLoss: empty input")

    # Pure bitcast-style reshapes; native dtype kept (cast happens in-kernel).
    p = prediction.reshape(-1)
    g = groundtruth.reshape(-1)

    rows = count // _LANE           # full lane-dense rows
    tail = count - rows * _LANE     # < 128 leftover elements

    sq_sum = jnp.float32(0.0)
    ab_sum = jnp.float32(0.0)

    if rows > 0:
        p2 = p[: rows * _LANE].reshape(rows, _LANE)
        g2 = g[: rows * _LANE].reshape(rows, _LANE)

        sub = max(_sublane_multiple(p2.dtype), _sublane_multiple(g2.dtype))
        bm = min(_round_up(block_rows, sub), _round_up(rows, sub))
        total_blocks = pl.cdiv(rows, bm)
        cores = max(1, min(num_cores, total_blocks))
        steps_per_core = pl.cdiv(total_blocks, cores)
        need_mask = (rows % bm) != 0

        def in_map(c, i):
            # Clamp so no block start lies past the array; the kernel skips /
            # masks the clamped-duplicate and ragged parts itself.
            blk = jnp.minimum(c * steps_per_core + i, total_blocks - 1)
            return (blk, 0)

        kernel = functools.partial(
            _mse_mae_sum_kernel,
            bm=bm, rows=rows, steps_per_core=steps_per_core,
            total_blocks=total_blocks, need_mask=need_mask)

        sq_part, ab_part = pl.pallas_call(
            kernel,
            out_shape=(jax.ShapeDtypeStruct((cores * _SUBLANE, _LANE), jnp.float32),
                       jax.ShapeDtypeStruct((cores * _SUBLANE, _LANE), jnp.float32)),
            grid=(cores, steps_per_core),
            in_specs=[pl.BlockSpec((bm, _LANE), in_map),
                      pl.BlockSpec((bm, _LANE), in_map)],
            out_specs=(pl.BlockSpec((_SUBLANE, _LANE), lambda c, i: (c, 0)),
                       pl.BlockSpec((_SUBLANE, _LANE), lambda c, i: (c, 0))),
            scratch_shapes=[pltpu.VMEM((_SUBLANE, _LANE), jnp.float32),
                            pltpu.VMEM((_SUBLANE, _LANE), jnp.float32)],
            compiler_params=pltpu.CompilerParams(
                # core axis parallel (v7x megacore), streaming axis = reduction
                dimension_semantics=("parallel", "arbitrary"),
                # Single tiling that double-buffers comfortably on all of
                # v5e/v6e (128 MiB) and v7x (64 MiB physical).
                vmem_limit_bytes=32 * 1024 * 1024,
            ),
        )(p2, g2)
        sq_sum = sq_sum + jnp.sum(sq_part)
        ab_sum = ab_sum + jnp.sum(ab_part)

    if tail > 0:
        # <128-element flat tail: negligible, handled with plain jnp (avoids a
        # full-array pad/copy just to round up to a lane multiple).
        dt = p[rows * _LANE:].astype(jnp.float32) - g[rows * _LANE:].astype(jnp.float32)
        sq_sum = sq_sum + jnp.sum(dt * dt)
        ab_sum = ab_sum + jnp.sum(jnp.abs(dt))

    return sq_sum, ab_sum, count


def reconstruction_loss(prediction, groundtruth, loss_names=("mse", "mae")):
    """Forward pass of ReconstructionLoss for the Pallas-translatable metrics.

    loss = sum_i loss_i(prediction, groundtruth) over loss_names.
    Only 'mse' and 'mae' are supported here (see TODOs at the top for
    'ssim' and 'perceptual').
    """
    sq_sum, ab_sum, count = _fused_sq_abs_sums(prediction, groundtruth)
    inv_count = jnp.float32(1.0 / count)
    parts = {"mse": sq_sum * inv_count, "mae": ab_sum * inv_count}
    total = jnp.float32(0.0)
    for name in loss_names:
        if name not in parts:
            raise NotImplementedError(f"loss '{name}' not implemented in Pallas")
        total = total + parts[name]
    return total


def _reconstruction_loss_ref(prediction, groundtruth, loss_names=("mse", "mae")):
    # pure-JAX reference mirroring torchmetrics MSE / MAE (mean reductions)
    d = prediction.astype(jnp.float32) - groundtruth.astype(jnp.float32)
    parts = {"mse": jnp.mean(d * d), "mae": jnp.mean(jnp.abs(d))}
    total = jnp.float32(0.0)
    for name in loss_names:
        total = total + parts[name]
    return total


if __name__ == "__main__":
    key = jax.random.PRNGKey(0)
    k1, k2 = jax.random.split(key)
    # batch=2, channels=3 (module uses 3-channel images), spatial=16
    shape = (2, 3, 16, 16)
    prediction = jax.random.normal(k1, shape, dtype=jnp.float32)
    groundtruth = jax.random.normal(k2, shape, dtype=jnp.float32)

    # jit so the flatten / prefix-slice reshapes fuse as bitcasts around the
    # pallas_call instead of materializing device copies.
    loss_fn = jax.jit(
        lambda p, g: reconstruction_loss(p, g, loss_names=("mse", "mae")))
    loss = loss_fn(prediction, groundtruth)
    jax.block_until_ready(loss)

    ref = _reconstruction_loss_ref(prediction, groundtruth, ("mse", "mae"))
    assert jnp.allclose(loss, ref, rtol=1e-5, atol=1e-5), (loss, ref)

    print("KERNEL_OK")
</pallas_src>

<mosaic_0001>
module attributes {stable_mosaic.version = 11 : i64} {
  func.func @_mse_mae_sum_kernel(%arg0: i32, %arg1: i32, %arg2: memref<16x128xf32, #tpu.memory_space<vmem>>, %arg3: memref<16x128xf32, #tpu.memory_space<vmem>>, %arg4: memref<8x128xf32, #tpu.memory_space<vmem>>, %arg5: memref<8x128xf32, #tpu.memory_space<vmem>>, %arg6: memref<8x128xf32, #tpu.memory_space<vmem>>, %arg7: memref<8x128xf32, #tpu.memory_space<vmem>>) attributes {dimension_semantics = [#tpu.dimension_semantics<parallel>, #tpu.dimension_semantics<arbitrary>], iteration_bounds = array<i64: 1, 1>, scalar_prefetch = 0 : i64, scratch_operands = 2 : i64, tpu.core_type = #tpu.core_type<tc>, window_params = [{transform_indices = @transform_0, window_bounds = array<i64: 16, 128>}, {transform_indices = @transform_1, window_bounds = array<i64: 16, 128>}, {transform_indices = @transform_2, window_bounds = array<i64: 8, 128>}, {transform_indices = @transform_3, window_bounds = array<i64: 8, 128>}]} {
    %c1_i32 = arith.constant 1 : i32
    %0 = arith.muli %arg0, %c1_i32 : i32
    %1 = arith.addi %0, %arg1 : i32
    %c0_i32 = arith.constant 0 : i32
    %2 = arith.cmpi eq, %arg1, %c0_i32 : i32
    %3 = arith.extui %2 : i1 to i32
    %c0_i32_0 = arith.constant 0 : i32
    %4 = arith.cmpi ne, %3, %c0_i32_0 : i32
    scf.if %4 {
      %cst = arith.constant 0.000000e+00 : f32
      %11 = vector.broadcast %cst : f32 to vector<8x128xf32>
      %c0 = arith.constant 0 : index
      %c0_5 = arith.constant 0 : index
      %12 = vector.load %arg6[%c0, %c0_5] : memref<8x128xf32, #tpu.memory_space<vmem>>, vector<8x128xf32>
      tpu.vector_store %arg6[%c0, %c0_5], %11 {strides = array<i32>} : memref<8x128xf32, #tpu.memory_space<vmem>>, vector<8x128xf32>,
      %cst_6 = arith.constant 0.000000e+00 : f32
      %13 = vector.broadcast %cst_6 : f32 to vector<8x128xf32>
      %c0_7 = arith.constant 0 : index
      %c0_8 = arith.constant 0 : index
      %14 = vector.load %arg7[%c0_7, %c0_8] : memref<8x128xf32, #tpu.memory_space<vmem>>, vector<8x128xf32>
      tpu.vector_store %arg7[%c0_7, %c0_8], %13 {strides = array<i32>} : memref<8x128xf32, #tpu.memory_space<vmem>>, vector<8x128xf32>,
    } else {
    }
    %c1_i32_1 = arith.constant 1 : i32
    %5 = arith.cmpi slt, %1, %c1_i32_1 : i32
    %6 = arith.extui %5 : i1 to i32
    %c0_i32_2 = arith.constant 0 : i32
    %7 = arith.cmpi ne, %6, %c0_i32_2 : i32
    scf.if %7 {
      %c0 = arith.constant 0 : index
      %c0_5 = arith.constant 0 : index
      %11 = vector.load %arg2[%c0, %c0_5] : memref<16x128xf32, #tpu.memory_space<vmem>>, vector<16x128xf32>
      %c0_6 = arith.constant 0 : index
      %c0_7 = arith.constant 0 : index
      %12 = vector.load %arg3[%c0_6, %c0_7] : memref<16x128xf32, #tpu.memory_space<vmem>>, vector<16x128xf32>
      %13 = arith.subf %11, %12 : vector<16x128xf32>
      %14 = tpu.iota {dimensions = array<i32: 0>} : vector<16x128xi32>
      %c16_i32 = arith.constant 16 : i32
      %15 = arith.muli %1, %c16_i32 : i32
      %16 = vector.broadcast %15 : i32 to vector<16x128xi32>
      %17 = arith.addi %14, %16 : vector<16x128xi32>
      %c12_i32 = arith.constant 12 : i32
      %18 = vector.broadcast %c12_i32 : i32 to vector<16x128xi32>
      %19 = arith.cmpi slt, %17, %18 : vector<16x128xi32>
      %cst = arith.constant 0.000000e+00 : f32
      %20 = vector.broadcast %cst : f32 to vector<16x128xf32>
      %21 = arith.select %19, %13, %20 : vector<16x128xi1>, vector<16x128xf32>
      %22 = arith.mulf %21, %21 : vector<16x128xf32>
      %23 = vector.shape_cast %22 : vector<16x128xf32> to vector<2x8x128xf32>
      %24 = math.absf %21 : vector<16x128xf32>
      %25 = vector.shape_cast %24 : vector<16x128xf32> to vector<2x8x128xf32>
      %c0_8 = arith.constant 0 : index
      %c0_9 = arith.constant 0 : index
      %26 = vector.load %arg6[%c0_8, %c0_9] : memref<8x128xf32, #tpu.memory_space<vmem>>, vector<8x128xf32>
      %cst_10 = arith.constant dense<0.000000e+00> : vector<8x128xf32>
      %27 = vector.multi_reduction <add>, %23, %cst_10 [0] : vector<2x8x128xf32> to vector<8x128xf32>
      %28 = arith.addf %26, %27 : vector<8x128xf32>
      %c0_11 = arith.constant 0 : index
      %c0_12 = arith.constant 0 : index
      %29 = vector.load %arg6[%c0_11, %c0_12] : memref<8x128xf32, #tpu.memory_space<vmem>>, vector<8x128xf32>
      tpu.vector_store %arg6[%c0_11, %c0_12], %28 {strides = array<i32>} : memref<8x128xf32, #tpu.memory_space<vmem>>, vector<8x128xf32>,
      %c0_13 = arith.constant 0 : index
      %c0_14 = arith.constant 0 : index
      %30 = vector.load %arg7[%c0_13, %c0_14] : memref<8x128xf32, #tpu.memory_space<vmem>>, vector<8x128xf32>
      %cst_15 = arith.constant dense<0.000000e+00> : vector<8x128xf32>
      %31 = vector.multi_reduction <add>, %25, %cst_15 [0] : vector<2x8x128xf32> to vector<8x128xf32>
      %32 = arith.addf %30, %31 : vector<8x128xf32>
      %c0_16 = arith.constant 0 : index
      %c0_17 = arith.constant 0 : index
      %33 = vector.load %arg7[%c0_16, %c0_17] : memref<8x128xf32, #tpu.memory_space<vmem>>, vector<8x128xf32>
      tpu.vector_store %arg7[%c0_16, %c0_17], %32 {strides = array<i32>} : memref<8x128xf32, #tpu.memory_space<vmem>>, vector<8x128xf32>,
    } else {
    }
    %c0_i32_3 = arith.constant 0 : i32
    %8 = arith.cmpi eq, %arg1, %c0_i32_3 : i32
    %9 = arith.extui %8 : i1 to i32
    %c0_i32_4 = arith.constant 0 : i32
    %10 = arith.cmpi ne, %9, %c0_i32_4 : i32
    scf.if %10 {
      %c0 = arith.constant 0 : index
      %c0_5 = arith.constant 0 : index
      %11 = vector.load %arg6[%c0, %c0_5] : memref<8x128xf32, #tpu.memory_space<vmem>>, vector<8x128xf32>
      %c0_6 = arith.constant 0 : index
      %c0_7 = arith.constant 0 : index
      %12 = vector.load %arg4[%c0_6, %c0_7] : memref<8x128xf32, #tpu.memory_space<vmem>>, vector<8x128xf32>
      tpu.vector_store %arg4[%c0_6, %c0_7], %11 {strides = array<i32>} : memref<8x128xf32, #tpu.memory_space<vmem>>, vector<8x128xf32>,
      %c0_8 = arith.constant 0 : index
      %c0_9 = arith.constant 0 : index
      %13 = vector.load %arg7[%c0_8, %c0_9] : memref<8x128xf32, #tpu.memory_space<vmem>>, vector<8x128xf32>
      %c0_10 = arith.constant 0 : index
      %c0_11 = arith.constant 0 : index
      %14 = vector.load %arg5[%c0_10, %c0_11] : memref<8x128xf32, #tpu.memory_space<vmem>>, vector<8x128xf32>
      tpu.vector_store %arg5[%c0_10, %c0_11], %13 {strides = array<i32>} : memref<8x128xf32, #tpu.memory_space<vmem>>, vector<8x128xf32>,
    } else {
    }
    return
  }
  func.func @transform_0(%arg0: i32, %arg1: i32) -> (i32, i32) {
    %c1_i32 = arith.constant 1 : i32
    %0 = arith.muli %arg0, %c1_i32 : i32
    %1 = arith.addi %0, %arg1 : i32
    %c0_i32 = arith.constant 0 : i32
    %2 = arith.minsi %1, %c0_i32 : i32
    %c0_i32_0 = arith.constant 0 : i32
    %c0_i32_1 = arith.constant 0 : i32
    return %2, %c0_i32_0 : i32, i32
  }
  func.func @transform_1(%arg0: i32, %arg1: i32) -> (i32, i32) {
    %c1_i32 = arith.constant 1 : i32
    %0 = arith.muli %arg0, %c1_i32 : i32
    %1 = arith.addi %0, %arg1 : i32
    %c0_i32 = arith.constant 0 : i32
    %2 = arith.minsi %1, %c0_i32 : i32
    %c0_i32_0 = arith.constant 0 : i32
    %c0_i32_1 = arith.constant 0 : i32
    return %2, %c0_i32_0 : i32, i32
  }
  func.func @transform_2(%arg0: i32, %arg1: i32) -> (i32, i32) {
    %c0_i32 = arith.constant 0 : i32
    %c0_i32_0 = arith.constant 0 : i32
    return %arg0, %c0_i32 : i32, i32
  }
  func.func @transform_3(%arg0: i32, %arg1: i32) -> (i32, i32) {
    %c0_i32 = arith.constant 0 : i32
    %c0_i32_0 = arith.constant 0 : i32
    return %arg0, %c0_i32 : i32, i32
  }
}

</mosaic_0001>

<bundles_post_ra>
// kernel: _lambda_.1
= control target key start
LH: loop header
LB: loop body
LE: loop exit
PB: predicated region body
PF: predicated region fallthrough
CT: control target
= control target key end

     0   :  { %v94_v0 = vlaneseq  ;;  %s182_s0 = inlined_call_operand.vmem [shape: f32[12,128], index: 0, kind: input, shape index: {}]   ;;  %s183_s1 = inlined_call_operand.vmem [shape: f32[12,128], index: 1, kind: input, shape index: {}]   ;;  %s184_s2 = inlined_call_operand.vmem [shape: f32[8,128], index: 2, kind: output, shape index: {0}]   ;;  %s185_s3 = inlined_call_operand.vmem [shape: f32[8,128], index: 3, kind: output, shape index: {1}]  }
   0x1   :  { %v88_v1 = vld [vmem:[%s182_s0] sm:$0xff]  ;;  %v89_v2 = vld [vmem:[%s182_s0 + $0x8] sm:$0xff] }
   0x2   :  { %v90_v3 = vld [vmem:[%s183_s1] sm:$0xff]  ;;  %v91_v4 = vld [vmem:[%s183_s1 + $0x8] sm:$0xff]  ;;  %v95_v6 = vshrl.u32 %v94_v0, 7 }
   0x3   :  { %v92_v5 = vsub.f32 %v88_v1, %v90_v3  ;;  %v93_v7 = vsub.f32 %v89_v2, %v91_v4 }
   0x4   :  { %v96_v8 = vadd.s32 8, %v95_v6 }
   0x5   :  { %v105_v9 = vmul.f32 %v92_v5, %v92_v5  ;;  %v107_v10 = vand.u32 2147483647, %v92_v5 }
   0x6   :  { %vm102_vm0 = vcmp.lt.s32.totalorder %v96_v8, 12 }
   0x7   :  { %v104_v11 = vsel %vm102_vm0, %v93_v7, 0.0 }
   0x8   :  { %v106_v12 = vmul.f32 %v104_v11, %v104_v11  ;;  %v108_v13 = vand.u32 2147483647, %v104_v11 }
   0xa   :  { %v110_v14 = vadd.f32 %v106_v12, %v105_v9  ;;  %v114_v15 = vadd.f32 %v108_v13, %v107_v10 }
   0xc   :  { %121 = vst [vmem:[%s184_s2] sm:$0xff] %v110_v14  ;;  %123 = vst [vmem:[%s185_s3] sm:$0xff] %v114_v15 }

</bundles_post_ra>
